<compile_context>
chip_gen: v6e
topology: v6e:2x2x1
jax: 0.10.0
libtpu: 0.0.40
codegen_flags: <defaults>
</compile_context>

<pallas_src>
import jax
import jax.numpy as jnp
from jax.experimental import pallas as pl
from jax.experimental.pallas import tpu as pltpu

VOCAB_SIZE = 50
HIDDEN_SIZE = 32
PAD = 8                          # sublane/lane padding for the [x|h|1] vector
KDIM = 2 * HIDDEN_SIZE + PAD     # 72: rows of the fused slab / lanes of carry


def encoder_gru_seq_kernel(tok_ref, emb_ref, slab_ref, h0_ref, out_ref, v_sc):
    """One grid step == one GRU time step (grid=(T,), sequential recurrence).

    tok_ref : SMEM (T,)        int32  scalar-prefetched token ids
    emb_ref : VMEM (V, H)      f32    embedding table (resident for all steps)
    slab_ref: VMEM (2H+8, 4H)  f32    fused weight/bias slab (resident)
    h0_ref  : VMEM (1, H)      f32    initial hidden state (read at t == 0)
    out_ref : VMEM (T, H)      f32    per-step hidden states (resident block)
    v_sc    : VMEM (1, 2H+8)   f32    carry buffer  [x | h | 1 | 0-pad]
    """
    H = HIDDEN_SIZE
    t = pl.program_id(0)

    @pl.when(t == 0)
    def _init():
        # v = [0..0 | h0 | 1 | 0..0]; the constant 1 multiplies the bias row.
        lane = jax.lax.broadcasted_iota(jnp.int32, (1, KDIM), 1)
        v_sc[...] = jnp.where(lane == 2 * H, 1.0, 0.0).astype(jnp.float32)
        v_sc[:, H:2 * H] = h0_ref[...]

    # Embedding lookup: copy row `tok` into the x slot of the carry buffer.
    tok = tok_ref[t]
    v_sc[:, 0:H] = emb_ref[pl.ds(tok, 1), :]

    v = v_sc[...]                                    # (1, 2H+8) = [x | h | 1 | 0]
    h_prev = v[:, H:2 * H]                           # (1, H)

    # Single fused MXU push: [rz_sum | gi_n | gh_n] in exactly 4H = 128 lanes,
    # biases folded in via the constant-1 column.
    g = jnp.dot(v, slab_ref[...], preferred_element_type=jnp.float32)  # (1, 4H)

    rz = jax.nn.sigmoid(g[:, 0:2 * H])               # packed r | z
    r = rz[:, 0:H]
    z = rz[:, H:2 * H]
    n = jnp.tanh(g[:, 2 * H:3 * H] + r * g[:, 3 * H:4 * H])
    h_new = (1.0 - z) * n + z * h_prev               # (1, H)

    out_ref[pl.ds(t, 1), :] = h_new                  # per-step output (resident)
    v_sc[:, H:2 * H] = h_new                         # carry to next step


def prepare_params(params):
    """One-time re-layout of PyTorch-layout params into the fused kernel slab."""
    H = HIDDEN_SIZE
    w_ih = params["weight_ih"]        # (3H, H), gate rows r | z | n
    w_hh = params["weight_hh"]        # (3H, H)
    b_ih = params["bias_ih"]          # (3H,)
    b_hh = params["bias_hh"]          # (3H,)

    slab = jnp.zeros((KDIM, 4 * H), jnp.float32)
    # x rows (0..H-1): r|z columns, then the gi_n column.
    slab = slab.at[0:H, 0:2 * H].set(w_ih[0:2 * H, :].T)
    slab = slab.at[0:H, 2 * H:3 * H].set(w_ih[2 * H:3 * H, :].T)
    # h rows (H..2H-1): r|z columns, then the gh_n column.
    slab = slab.at[H:2 * H, 0:2 * H].set(w_hh[0:2 * H, :].T)
    slab = slab.at[H:2 * H, 3 * H:4 * H].set(w_hh[2 * H:3 * H, :].T)
    # Bias row (row 2H, multiplied by the constant 1 in [x|h|1]):
    # r|z biases merge; b_in stays with gi_n, b_hn stays with gh_n (scaled by r).
    bias_row = jnp.concatenate(
        [b_ih[0:2 * H] + b_hh[0:2 * H], b_ih[2 * H:3 * H], b_hh[2 * H:3 * H]])
    slab = slab.at[2 * H, :].set(bias_row)
    return {"embedding": params["embedding"].astype(jnp.float32), "slab": slab}


def encoder_rnn_encode(tokens, hidden0, kernel_params):
    """Fused encode loop: T GRU steps in ONE pallas_call.

    tokens : int32 [T];  hidden0 : f32 [1, 1, H]
    Returns (outputs [1, T, H], hidden [1, 1, H]) — identical to calling the
    PyTorch module's forward() once per token and stacking the outputs.
    """
    H = HIDDEN_SIZE
    T = tokens.shape[0]
    emb = kernel_params["embedding"]
    slab = kernel_params["slab"]
    V = emb.shape[0]
    h0 = hidden0.reshape(1, H).astype(jnp.float32)

    grid_spec = pltpu.PrefetchScalarGridSpec(
        num_scalar_prefetch=1,                                    # token ids -> SMEM
        grid=(T,),
        in_specs=[
            pl.BlockSpec((V, H), lambda t, tok: (0, 0)),          # embedding, resident
            pl.BlockSpec((KDIM, 4 * H), lambda t, tok: (0, 0)),   # fused slab, resident
            pl.BlockSpec((1, H), lambda t, tok: (0, 0)),          # h0, resident
        ],
        out_specs=pl.BlockSpec((T, H), lambda t, tok: (0, 0)),    # resident output block
        scratch_shapes=[pltpu.VMEM((1, KDIM), jnp.float32)],      # [x|h|1|pad] carry
    )

    outs = pl.pallas_call(
        encoder_gru_seq_kernel,
        grid_spec=grid_spec,
        out_shape=jax.ShapeDtypeStruct((T, H), jnp.float32),
        compiler_params=pltpu.CompilerParams(
            dimension_semantics=("arbitrary",)),                  # sequential recurrence
    )(tokens.astype(jnp.int32), emb, slab, h0)

    outputs = outs.reshape(1, T, H)                               # batch_first outputs
    hidden = outs[T - 1].reshape(1, 1, H)                         # final hidden
    return outputs, hidden


def encoder_rnn_forward(x_tok, hidden, kernel_params):
    """Original module signature: x [1] int, hidden [1,1,H] -> (output, hidden)."""
    outputs, hidden_new = encoder_rnn_encode(x_tok.reshape(1), hidden, kernel_params)
    return outputs.reshape(1, 1, HIDDEN_SIZE), hidden_new


def encoder_rnn_reference(tokens, hidden, params):
    """Pure-JAX reference mirroring torch.nn.GRU (gate order r, z, n) step-by-step."""
    H = HIDDEN_SIZE
    h = hidden.reshape(1, H)
    outs = []
    for i in range(tokens.shape[0]):
        x = params["embedding"][tokens[i]].reshape(1, H)
        gi = x @ params["weight_ih"].T + params["bias_ih"]        # (1, 3H)
        gh = h @ params["weight_hh"].T + params["bias_hh"]        # (1, 3H)
        i_r, i_z, i_n = gi[:, :H], gi[:, H:2 * H], gi[:, 2 * H:]
        h_r, h_z, h_n = gh[:, :H], gh[:, H:2 * H], gh[:, 2 * H:]
        r = jax.nn.sigmoid(i_r + h_r)
        z = jax.nn.sigmoid(i_z + h_z)
        n = jnp.tanh(i_n + r * h_n)
        h = (1.0 - z) * n + z * h
        outs.append(h)
    outputs = jnp.stack(outs, axis=1)                             # (1, T, H)
    return outputs, h.reshape(1, 1, H)


def init_params(key, vocab_size, hidden_size):
    k_emb, k_wih, k_whh, k_bih, k_bhh = jax.random.split(key, 5)
    scale = 1.0 / jnp.sqrt(hidden_size)
    return {
        "embedding": jax.random.normal(k_emb, (vocab_size, hidden_size), jnp.float32),
        "weight_ih": jax.random.uniform(k_wih, (3 * hidden_size, hidden_size),
                                        jnp.float32, -scale, scale),
        "weight_hh": jax.random.uniform(k_whh, (3 * hidden_size, hidden_size),
                                        jnp.float32, -scale, scale),
        "bias_ih": jax.random.uniform(k_bih, (3 * hidden_size,),
                                      jnp.float32, -scale, scale),
        "bias_hh": jax.random.uniform(k_bhh, (3 * hidden_size,),
                                      jnp.float32, -scale, scale),
    }


if __name__ == "__main__":
    key = jax.random.PRNGKey(0)
    k_params, k_tok = jax.random.split(key)

    params = init_params(k_params, VOCAB_SIZE, HIDDEN_SIZE)
    kernel_params = prepare_params(params)     # one-time re-layout (outside forward)

    SEQ_LEN = 8
    tokens = jax.random.randint(k_tok, (SEQ_LEN,), 0, VOCAB_SIZE, dtype=jnp.int32)
    hidden0 = jnp.zeros((1, 1, HIDDEN_SIZE), jnp.float32)         # init_hidden()

    # Whole encode loop fused into ONE pallas_call (main perf win).
    encode = jax.jit(encoder_rnn_encode)
    outputs, hidden = encode(tokens, hidden0, kernel_params)
    jax.block_until_ready((outputs, hidden))

    # Original per-token forward signature (T = 1 call of the same kernel).
    step = jax.jit(encoder_rnn_forward)
    out1, hid1 = step(tokens[:1], hidden0, kernel_params)
    jax.block_until_ready((out1, hid1))

    # Verify against the pure-JAX torch.nn.GRU reference.
    outputs_ref, hidden_ref = encoder_rnn_reference(tokens, hidden0, params)
    assert outputs.shape == (1, SEQ_LEN, HIDDEN_SIZE)
    assert hidden.shape == (1, 1, HIDDEN_SIZE)
    assert jnp.allclose(outputs, outputs_ref, atol=1e-4, rtol=1e-4)
    assert jnp.allclose(hidden, hidden_ref, atol=1e-4, rtol=1e-4)
    assert out1.shape == (1, 1, HIDDEN_SIZE) and hid1.shape == (1, 1, HIDDEN_SIZE)
    assert jnp.allclose(out1, outputs_ref[:, :1, :], atol=1e-4, rtol=1e-4)
    assert jnp.allclose(hid1, outputs_ref[:, :1, :], atol=1e-4, rtol=1e-4)

    print("KERNEL_OK")
</pallas_src>

<mosaic_0001>
module attributes {stable_mosaic.version = 11 : i64} {
  func.func @encoder_gru_seq_kernel(%arg0: i32, %arg1: memref<8xi32, #tpu.memory_space<smem>>, %arg2: memref<50x32xf32, #tpu.memory_space<vmem>>, %arg3: memref<72x128xf32, #tpu.memory_space<vmem>>, %arg4: memref<1x32xf32, #tpu.memory_space<vmem>>, %arg5: memref<8x32xf32, #tpu.memory_space<vmem>>, %arg6: memref<1x72xf32, #tpu.memory_space<vmem>>) attributes {dimension_semantics = [#tpu.dimension_semantics<arbitrary>], iteration_bounds = array<i64: 8>, scalar_prefetch = 1 : i64, scratch_operands = 1 : i64, tpu.core_type = #tpu.core_type<tc>, window_params = [{pipeline_mode = #tpu.pipeline_mode<synchronous>, transform_indices = @transform_0, window_bounds = array<i64: 50, 32>}, {pipeline_mode = #tpu.pipeline_mode<synchronous>, transform_indices = @transform_1, window_bounds = array<i64: 72, 128>}, {pipeline_mode = #tpu.pipeline_mode<synchronous>, transform_indices = @transform_2, window_bounds = array<i64: 1, 32>}, {pipeline_mode = #tpu.pipeline_mode<synchronous>, transform_indices = @transform_3, window_bounds = array<i64: 8, 32>}]} {
    %c0_i32 = arith.constant 0 : i32
    %0 = arith.cmpi eq, %arg0, %c0_i32 : i32
    %1 = arith.extui %0 : i1 to i32
    %c0_i32_0 = arith.constant 0 : i32
    %2 = arith.cmpi ne, %1, %c0_i32_0 : i32
    scf.if %2 {
      %33 = tpu.iota {dimensions = array<i32: 1>} : vector<1x72xi32>
      %c64_i32 = arith.constant 64 : i32
      %34 = vector.broadcast %c64_i32 : i32 to vector<1x72xi32>
      %35 = arith.cmpi eq, %33, %34 : vector<1x72xi32>
      %cst_11 = arith.constant 1.000000e+00 : f32
      %cst_12 = arith.constant 0.000000e+00 : f32
      %36 = vector.broadcast %cst_11 : f32 to vector<1x72xf32>
      %37 = vector.broadcast %cst_12 : f32 to vector<1x72xf32>
      %38 = arith.select %35, %36, %37 : vector<1x72xi1>, vector<1x72xf32>
      %c0_13 = arith.constant 0 : index
      %c0_14 = arith.constant 0 : index
      %39 = vector.load %arg6[%c0_13, %c0_14] : memref<1x72xf32, #tpu.memory_space<vmem>>, vector<1x72xf32>
      tpu.vector_store %arg6[%c0_13, %c0_14], %38 {strides = array<i32>} : memref<1x72xf32, #tpu.memory_space<vmem>>, vector<1x72xf32>,
      %c0_15 = arith.constant 0 : index
      %c0_16 = arith.constant 0 : index
      %40 = vector.load %arg4[%c0_15, %c0_16] : memref<1x32xf32, #tpu.memory_space<vmem>>, vector<1x32xf32>
      %c0_17 = arith.constant 0 : index
      %c32_18 = arith.constant 32 : index
      %41 = vector.load %arg6[%c0_17, %c32_18] : memref<1x72xf32, #tpu.memory_space<vmem>>, vector<1x32xf32>
      tpu.vector_store %arg6[%c0_17, %c32_18], %40 {strides = array<i32>} : memref<1x72xf32, #tpu.memory_space<vmem>>, vector<1x32xf32>,
    } else {
    }
    %3 = arith.index_cast %arg0 : i32 to index
    %4 = memref.load %arg1[%3] : memref<8xi32, #tpu.memory_space<smem>>
    %5 = arith.index_cast %4 : i32 to index
    %c0 = arith.constant 0 : index
    %6 = vector.load %arg2[%5, %c0] : memref<50x32xf32, #tpu.memory_space<vmem>>, vector<1x32xf32>
    %c0_1 = arith.constant 0 : index
    %c0_2 = arith.constant 0 : index
    %7 = vector.load %arg6[%c0_1, %c0_2] : memref<1x72xf32, #tpu.memory_space<vmem>>, vector<1x32xf32>
    tpu.vector_store %arg6[%c0_1, %c0_2], %6 {strides = array<i32>} : memref<1x72xf32, #tpu.memory_space<vmem>>, vector<1x32xf32>,
    %c0_3 = arith.constant 0 : index
    %c0_4 = arith.constant 0 : index
    %8 = vector.load %arg6[%c0_3, %c0_4] : memref<1x72xf32, #tpu.memory_space<vmem>>, vector<1x72xf32>
    %9 = vector.extract_strided_slice %8 {offsets = [0, 32], sizes = [1, 32], strides = [1, 1]} : vector<1x72xf32> to vector<1x32xf32>
    %c0_5 = arith.constant 0 : index
    %c0_6 = arith.constant 0 : index
    %10 = vector.load %arg3[%c0_5, %c0_6] : memref<72x128xf32, #tpu.memory_space<vmem>>, vector<72x128xf32>
    %cst = arith.constant dense<0.000000e+00> : vector<1x128xf32>
    %11 = tpu.matmul %8, %10, %cst {dimension_numbers = #tpu.dot_dimension_numbers<[1], [0], [0], [1], [0, 0, 1, 1], [], []>} : vector<1x72xf32>, vector<72x128xf32>, vector<1x128xf32> -> vector<1x128xf32>
    %12 = vector.extract_strided_slice %11 {offsets = [0, 0], sizes = [1, 64], strides = [1, 1]} : vector<1x128xf32> to vector<1x64xf32>
    %13 = arith.negf %12 : vector<1x64xf32>
    %14 = math.exp %13 : vector<1x64xf32>
    %cst_7 = arith.constant 1.000000e+00 : f32
    %15 = vector.broadcast %cst_7 : f32 to vector<1x64xf32>
    %16 = arith.addf %15, %14 : vector<1x64xf32>
    %17 = arith.divf %15, %16 : vector<1x64xf32>
    %18 = vector.extract_strided_slice %17 {offsets = [0, 0], sizes = [1, 32], strides = [1, 1]} : vector<1x64xf32> to vector<1x32xf32>
    %19 = vector.extract_strided_slice %17 {offsets = [0, 32], sizes = [1, 32], strides = [1, 1]} : vector<1x64xf32> to vector<1x32xf32>
    %20 = vector.extract_strided_slice %11 {offsets = [0, 64], sizes = [1, 32], strides = [1, 1]} : vector<1x128xf32> to vector<1x32xf32>
    %21 = vector.extract_strided_slice %11 {offsets = [0, 96], sizes = [1, 32], strides = [1, 1]} : vector<1x128xf32> to vector<1x32xf32>
    %22 = arith.mulf %18, %21 : vector<1x32xf32>
    %23 = arith.addf %20, %22 : vector<1x32xf32>
    %24 = math.tanh %23 : vector<1x32xf32>
    %cst_8 = arith.constant 1.000000e+00 : f32
    %25 = vector.broadcast %cst_8 : f32 to vector<1x32xf32>
    %26 = arith.subf %25, %19 : vector<1x32xf32>
    %27 = arith.mulf %26, %24 : vector<1x32xf32>
    %28 = arith.mulf %19, %9 : vector<1x32xf32>
    %29 = arith.addf %27, %28 : vector<1x32xf32>
    %30 = arith.index_cast %arg0 : i32 to index
    %c0_9 = arith.constant 0 : index
    %31 = vector.load %arg5[%30, %c0_9] : memref<8x32xf32, #tpu.memory_space<vmem>>, vector<1x32xf32>
    tpu.vector_store %arg5[%30, %c0_9], %29 {strides = array<i32>} : memref<8x32xf32, #tpu.memory_space<vmem>>, vector<1x32xf32>,
    %c0_10 = arith.constant 0 : index
    %c32 = arith.constant 32 : index
    %32 = vector.load %arg6[%c0_10, %c32] : memref<1x72xf32, #tpu.memory_space<vmem>>, vector<1x32xf32>
    tpu.vector_store %arg6[%c0_10, %c32], %29 {strides = array<i32>} : memref<1x72xf32, #tpu.memory_space<vmem>>, vector<1x32xf32>,
    return
  }
  func.func @transform_0(%arg0: i32, %arg1: memref<8xi32, #tpu.memory_space<smem>>) -> (i32, i32) {
    %c0_i32 = arith.constant 0 : i32
    %c0_i32_0 = arith.constant 0 : i32
    %c0_i32_1 = arith.constant 0 : i32
    return %c0_i32, %c0_i32_0 : i32, i32
  }
  func.func @transform_1(%arg0: i32, %arg1: memref<8xi32, #tpu.memory_space<smem>>) -> (i32, i32) {
    %c0_i32 = arith.constant 0 : i32
    %c0_i32_0 = arith.constant 0 : i32
    %c0_i32_1 = arith.constant 0 : i32
    return %c0_i32, %c0_i32_0 : i32, i32
  }
  func.func @transform_2(%arg0: i32, %arg1: memref<8xi32, #tpu.memory_space<smem>>) -> (i32, i32) {
    %c0_i32 = arith.constant 0 : i32
    %c0_i32_0 = arith.constant 0 : i32
    %c0_i32_1 = arith.constant 0 : i32
    return %c0_i32, %c0_i32_0 : i32, i32
  }
  func.func @transform_3(%arg0: i32, %arg1: memref<8xi32, #tpu.memory_space<smem>>) -> (i32, i32) {
    %c0_i32 = arith.constant 0 : i32
    %c0_i32_0 = arith.constant 0 : i32
    %c0_i32_1 = arith.constant 0 : i32
    return %c0_i32, %c0_i32_0 : i32, i32
  }
}

</mosaic_0001>

<bundles_post_ra>
// kernel: encoder_rnn_encode.1
= control target key start
LH: loop header
LB: loop body
LE: loop exit
PB: predicated region body
PF: predicated region fallthrough
CT: control target
= control target key end

     0   :  { %s478_s0 = inlined_call_operand.vmem [shape: s32[8], index: 0, kind: input, shape index: {}]   ;;  %s479_s1 = inlined_call_operand.vmem [shape: f32[50,32], index: 1, kind: input, shape index: {}]   ;;  %s480_s2 = inlined_call_operand.vmem [shape: f32[72,128], index: 2, kind: input, shape index: {}]   ;;  %s481_s3 = inlined_call_operand.vmem [shape: f32[1,32], index: 3, kind: input, shape index: {}]   ;;  %s482_s4 = inlined_call_operand.vmem [shape: f32[8,32], index: 4, kind: output, shape index: {}]  }
   0x1   :  { %s9_s17 = sshll.u32 %s478_s0, 4  ;;  %s10_s17 = int_to_ptr.vmem [resolvable:$true] %s9_s17 }
   0x2   :  { %s366_s18 = scalar_lea.vmem %s10_s17, 16  ;;  %p371_p1 = scmp.lt.s32.totalorder %s10_s17, %s10_s17 }
   0x3   :  { %p367_p0 = scmp.ne.s32.totalorder %s10_s17, %s366_s18  ;;  %p372_p2 = scmp.lt.s32.totalorder %s366_s18, %s366_s18 }
   0x5   :  { %p373_p3 = por %p372_p2, %p371_p1 }
   0x7   :  { %p374_p4 = pnand %p373_p3, %p367_p0 }
   0x9   :  { %377 = shalt.err (!%p374_p4)  }
   0xa   :  { %s388_s19 = smov [#allocation4]  }
   0xb   :  { %12 = dma.vmem_to_smem %s10_s17, 16, %s388_s19, [#allocation3] }
   0xc   :  { %382 = dma.done.wait [#allocation3], 16 }
   0xd   :  { %383 = vsyncadd [#allocation3], 4294967280 }
   0xe   :  { %14 = sfence }
   0xf   :  { %s424_s20 = smov 0  }
  0x10 LB: > { %s430_s0 = sadd.s32 4294967295, %s386_s20   ;;  %p306_p5 = scmp.ge.s32.totalorder %s386_s20, 1  ;;  %s386_s20 = sphi %s424_s20, %s20_s20  }
  0x11   : > { %p129_p6 = scmp.lt.s32.totalorder %s386_s20, 9 }
  0x13   : > { %p130_p7 = pnand %p306_p5, %p129_p6 }
  0x14   : > { %p307_p8 = scmp.ne.s32.totalorder (!%p130_p7), %s430_s0, 0 }
  0x15   : > { %133 = sbr.rel (%p130_p7) target bundleno = 843 (0x34b), region = 32 }
  0x1a   : > { %146 = sbr.rel (%p307_p8) target bundleno = 148 (0x94), region = 36  ;;  %s389_s23 = smov (!%p307_p8), 32  }
  0x1f   : > { %v308_v0 = vld [vmem:[%s481_s3] ss:$0 sm:$0xff]  ;;  %v147_v1 = vlaneseq  ;;  %vm151_vm0 = vcmask 581632   ;;  %v390_v3 = vmov 0.0   ;;  %vm162_vm2 = vcmask 516352  }
  0x20   : > { %159 = vrot.lane.b32.xlu0 %v308_v0, %s389_s23 }
  0x21   : > { %v148_v2 = vand.u32 127, %v147_v1 }
  0x23   : > { %vm149_vm1 = vcmp.eq.s32.totalorder %v148_v2, 64 }
  0x24   : > { %v150_v4 = vsel %vm149_vm1, 1.0, %v390_v3 }
  0x25   : > { %152 = vst.msk [vmem:[#allocation2] sm:$0x1] %vm151_vm0, %v150_v4 }
  0x92   : > { %v160_v5 = vpop.permute.xlu0 %159 }
  0x93   : > { %163 = vst.msk [vmem:[#allocation2] sm:$0x1] %vm162_vm2, %v160_v5 }
  0x94 PF: > { %v178_v6 = vld [vmem:[%s480_s2 + $0x40] sm:$0xff]  ;;  %s164_s26 = sld [smem:[#allocation4 + %s430_s0]]  ;;  %v391_v7 = vmov 0.0   ;;  %v177_v8 = vld [vmem:[%s480_s2 + $0x38] sm:$0xff]  ;;  %vm392_vm3 = vmmov 0   ;;  %v176_v9 = vld [vmem:[%s480_s2 + $0x30] sm:$0xff] }
  0x95   : > { %323 = vmatprep.subr.mxu0 %v391_v7  ;;  %341 = vmatprep.mubr.msk.f32.mxu0 %vm392_vm3, %v391_v7  ;;  %v175_v10 = vld [vmem:[%s480_s2 + $0x28] sm:$0xff]  ;;  %vm167_vm4 = vcmask 253952   ;;  %v174_v11 = vld [vmem:[%s480_s2 + $0x20] sm:$0xff]  ;;  %v173_v13 = vld [vmem:[%s480_s2 + $0x18] sm:$0xff]  ;;  %vm179_vm5 = vcmask 588800   ;;  %s393_s21 = smov 32  }
  0x96   : > { %324 = vmatpush3.msra.mxu0 %v178_v6  ;;  %v172_v14 = vld [vmem:[%s480_s2 + $0x10] sm:$0xff]  ;;  %v171_v15 = vld [vmem:[%s480_s2 + $0x8] sm:$0xff]  ;;  %v170_v16 = vld [vmem:[%s480_s2] sm:$0xff]  ;;  %s394_s22 = smov 64   ;;  %s395_s23 = smov 96   ;;  %vm284_vm6 = vcmask 516352  }
  0x97   : > { %325 = vmatprep.subr.mxu0 %v391_v7 }
  0x98   : > { %326 = vmatpush3.msra.mxu0 %v177_v8 }
  0x99   : > { %327 = vmatprep.subr.mxu0 %v391_v7 }
  0x9a   : > { %328 = vmatpush3.msra.mxu0 %v176_v9  ;;  %s165_s9 = scalar_lea.vmem %s479_s1, %s164_s26  ;;  %s282_s26 = scalar_lea.vmem %s482_s4, %s430_s0 }
  0x9b   : > { %329 = vmatprep.subr.mxu0 %v391_v7  ;;  %v166_v12 = vld [vmem:[%s165_s9] sm:$0x1] }
  0x9c   : > { %330 = vmatpush3.msra.mxu0 %v175_v10  ;;  %168 = vst.msk [vmem:[#allocation2] sm:$0x1] %vm167_vm4, %v166_v12 }
  0x9d   : > { %331 = vmatprep.subr.mxu0 %v391_v7 }
  0x9e   : > { %332 = vmatpush3.msra.mxu0 %v174_v11 }
  0x9f   : > { %333 = vmatprep.subr.mxu0 %v391_v7 }
  0xa0   : > { %334 = vmatpush3.msra.mxu0 %v173_v13 }
  0xa1   : > { %335 = vmatprep.subr.mxu0 %v391_v7 }
  0xa2   : > { %336 = vmatpush3.msra.mxu0 %v172_v14 }
  0xa3   : > { %337 = vmatprep.subr.mxu0 %v391_v7  ;;  %v169_v17 = vld [vmem:[#allocation2] sm:$0x1] }
  0xa4   : > { %338 = vmatpush3.msra.mxu0 %v171_v15 }
  0xa5   : > { %339 = vmatprep.subr.mxu0 %v391_v7 }
  0xa6   : > { %340 = vmatpush3.msra.mxu0 %v170_v16 }
  0xa7   : > { %342 = vmatmul.mubr.msk.f32.vlgmr.msra.gmra.mxu0 %vm179_vm5, %v169_v17 }
 0x167   : > { %v249_v18 = vpop.f32.mrf.mxu0 }
 0x168   : > { %260 = vrot.lane.b32.xlu0 %v249_v18, %s393_s21  ;;  %v310_v20 = vmul.f32 -1.442695, %v249_v18 }
 0x169   : > { %v343_v19 = vpop.f32.mrf.mxu0 }
 0x16a   : > { %360 = vpow2.f32 %v310_v20 }
 0x177   : > { %v361_v21 = vpop.eup %360 }
 0x178   : > { %v256_v22 = vadd.f32 1.0, %v361_v21 }
 0x17a   : > { %362 = vrcp.f32 %v256_v22 }
 0x187   : > { %v363_v23 = vpop.eup %362 }
 0x188   : > { %v270_v29 = vsub.f32 1.0, %v363_v23  ;;  %v276_v31 = vmul.f32 %v363_v23, %v169_v17 }
 0x1da   : > { %v261_v24 = vpop.permute.xlu0 %260 }
 0x1db   : > { %v263_v25 = vmul.f32 %v363_v23, %v261_v24 }
 0x1dd   : > { %265 = vrot.lane.b32.xlu0 %v263_v25, %s394_s22 }
 0x24f   : > { %v266_v26 = vpop.permute.xlu0 %265 }
 0x250   : > { %v268_v27 = vadd.f32 %v266_v26, %v249_v18 }
 0x252   : > { %364 = vtanh.f32 %v268_v27 }
 0x25f   : > { %v365_v28 = vpop.eup %364 }
 0x260   : > { %272 = vrot.lane.b32.xlu1 %v365_v28, %s395_s23 }
 0x2d2   : > { %v273_v30 = vpop.permute.xlu1 %272 }
 0x2d3   : > { %v275_v32 = vmul.f32 %v273_v30, %v270_v29 }
 0x2d5   : > { %v277_v33 = vadd.f32 %v276_v31, %v275_v32 }
 0x2d7   : > { %285 = vst.msk [vmem:[#allocation2] sm:$0x1] %vm284_vm6, %v277_v33  ;;  %279 = vrot.lane.b32.xlu1 %v277_v33, %s395_s23 }
 0x349   : > { %v280_v34 = vpop.permute.xlu1 %279 }
 0x34a   : > { %283 = vst.msk [vmem:[%s282_s26] sm:$0x1] %vm167_vm4, %v280_v34 }
 0x34b PF: > { %s20_s20 = sadd.s32 1, %s386_s20  }
 0x34c   : > { %p17_p9 = scmp.ge.s32.totalorder %s20_s20, 10  }
 0x34e   :  { %19 = sbr.rel (!%p17_p9) target bundleno = 16 (0x10), region = 61 }

</bundles_post_ra>
